<compile_context>
chip_gen: v7x
topology: tpu7x:2x2x1
jax: 0.10.0
libtpu: 0.0.40
codegen_flags: <defaults>
</compile_context>

<pallas_src>
import functools

import jax
import jax.numpy as jnp
from jax.experimental import pallas as pl
from jax.experimental.pallas import tpu as pltpu


def _round_up(x: int, m: int) -> int:
    return ((x + m - 1) // m) * m


def _swiglu_kernel(x_ref, w1t_ref, w3t_ref, w2t_ref, o_ref, acc_ref):
    # Grid = (token_tiles, d_ff_tiles); axis 1 is the d_ff reduction.
    k = pl.program_id(1)

    @pl.when(k == 0)
    def _():
        acc_ref[...] = jnp.zeros_like(acc_ref)

    # Native-dtype operands on the MXU, f32 accumulation.
    x = x_ref[...]                                                       # (tm, d_model)
    h1 = jnp.dot(x, w1t_ref[...], preferred_element_type=jnp.float32)   # (tm, tf)
    h3 = jnp.dot(x, w3t_ref[...], preferred_element_type=jnp.float32)   # (tm, tf)
    gated = (h1 * jax.nn.sigmoid(h1)) * h3                               # SiLU gate, f32
    acc_ref[...] += jnp.dot(gated.astype(w2t_ref.dtype), w2t_ref[...],
                            preferred_element_type=jnp.float32)          # (tm, d_model)

    @pl.when(k == pl.num_programs(1) - 1)
    def _():
        o_ref[...] = acc_ref[...].astype(o_ref.dtype)


@functools.partial(jax.jit, static_argnames=("block_tokens", "block_dff"))
def swiglu_ffn_pretransposed(x, w1t, w3t, w2t, *, block_tokens=256, block_dff=512):
    """x: (..., d_model); w1t/w3t: (d_model, d_ff); w2t: (d_ff, d_model)."""
    d_model = x.shape[-1]
    d_ff = w1t.shape[-1]
    lead = x.shape[:-1]
    x2d = x.reshape(-1, d_model)
    n = x2d.shape[0]

    # Token tile: big by default for full-height MXU passes; clamp + zero-pad
    # for small / ragged inputs (padded rows are zeros and get sliced off).
    tm = min(block_tokens, _round_up(max(n, 1), 8))
    n_pad = _round_up(max(n, 1), tm)
    if n_pad != n:
        x2d = jnp.pad(x2d, ((0, n_pad - n), (0, 0)))

    # d_ff tile: stream weight slices so VMEM usage is bounded for real shapes.
    tf = min(block_dff, d_ff)
    dff_pad = _round_up(d_ff, tf)
    if dff_pad != d_ff:
        # Padded d_ff columns: h1 = h3 = 0 -> silu(0)*0 = 0 -> no contribution.
        w1t = jnp.pad(w1t, ((0, 0), (0, dff_pad - d_ff)))
        w3t = jnp.pad(w3t, ((0, 0), (0, dff_pad - d_ff)))
        w2t = jnp.pad(w2t, ((0, dff_pad - d_ff), (0, 0)))

    grid = (n_pad // tm, dff_pad // tf)

    x_item = jnp.dtype(x2d.dtype).itemsize
    w_item = jnp.dtype(w1t.dtype).itemsize
    cost = pl.CostEstimate(
        flops=6 * n_pad * d_model * dff_pad,            # 3 matmuls x 2 flops/MAC
        transcendentals=n_pad * dff_pad,                # sigmoid
        bytes_accessed=(grid[1] * n_pad * d_model * x_item          # x re-read per k
                        + grid[0] * 3 * d_model * dff_pad * w_item  # weights per i
                        + n_pad * d_model * x_item),                # output
    )

    # Conservative VMEM budget: double-buffered in/out tiles + f32 accumulator,
    # clamped so it stays sane across v5e/v6e (128 MiB) and v7x (64 MiB).
    need = (2 * tm * d_model * x_item          # x tiles
            + 2 * 2 * d_model * tf * w_item    # w1t + w3t tiles
            + 2 * tf * d_model * w_item        # w2t tiles
            + 2 * tm * d_model * x_item        # output tiles
            + tm * d_model * 4)                # f32 accumulator
    vmem_limit = int(min(max(2 * need, 32 * 2**20), 96 * 2**20))

    out2d = pl.pallas_call(
        _swiglu_kernel,
        out_shape=jax.ShapeDtypeStruct((n_pad, d_model), x.dtype),
        grid_spec=pltpu.PrefetchScalarGridSpec(
            num_scalar_prefetch=0,
            grid=grid,
            in_specs=[
                pl.BlockSpec((tm, d_model), lambda i, k: (i, 0)),   # x tokens
                pl.BlockSpec((d_model, tf), lambda i, k: (0, k)),   # w1t slice
                pl.BlockSpec((d_model, tf), lambda i, k: (0, k)),   # w3t slice
                pl.BlockSpec((tf, d_model), lambda i, k: (k, 0)),   # w2t slice
            ],
            out_specs=pl.BlockSpec((tm, d_model), lambda i, k: (i, 0)),
            scratch_shapes=[pltpu.VMEM((tm, d_model), jnp.float32)],
        ),
        compiler_params=pltpu.CompilerParams(
            dimension_semantics=("parallel", "arbitrary"),
            vmem_limit_bytes=vmem_limit,
        ),
        cost_estimate=cost,
    )(x2d, w1t, w3t, w2t)

    if n_pad != n:
        out2d = out2d[:n]
    return out2d.reshape(*lead, d_model)


def swiglu_ffn(x, w1, w2, w3, *, block_tokens=256, block_dff=512):
    """PyTorch-layout convenience wrapper: w1/w3: (d_ff, d_model), w2: (d_model, d_ff).

    For production, store weights pre-transposed and call
    swiglu_ffn_pretransposed directly so the transposes are not paid per call.
    """
    return swiglu_ffn_pretransposed(x, w1.T, w3.T, w2.T,
                                    block_tokens=block_tokens, block_dff=block_dff)


def _trunc_normal(key, shape, std):
    # Mirrors torch.nn.init.trunc_normal_(mean=0, std=std, a=-2, b=2).
    lo, hi = -2.0 / std, 2.0 / std
    return jax.random.truncated_normal(key, lo, hi, shape, dtype=jnp.float32) * std


def _ref_swiglu(x, w1, w2, w3):
    h1 = x @ w1.T
    return ((h1 * jax.nn.sigmoid(h1)) * (x @ w3.T)) @ w2.T


if __name__ == "__main__":
    key = jax.random.PRNGKey(0)

    # --- Test 1: exercises the d_ff reduction axis (two k-tiles + accumulator) ---
    batch, seq, d_model, d_ff = 2, 8, 64, 256
    kx, k1, k2, k3, knext = jax.random.split(key, 5)
    std = 2.0 / (d_ff + d_model)
    w1 = _trunc_normal(k1, (d_ff, d_model), std)
    w2 = _trunc_normal(k2, (d_model, d_ff), std)
    w3 = _trunc_normal(k3, (d_ff, d_model), std)
    x = jax.random.normal(kx, (batch, seq, d_model), dtype=jnp.float32)

    # Pre-transpose once at "parameter setup" time.
    w1t, w3t, w2t = w1.T, w3.T, w2.T
    out = swiglu_ffn_pretransposed(x, w1t, w3t, w2t, block_tokens=256, block_dff=128)
    out = jax.block_until_ready(out)
    ref = _ref_swiglu(x, w1, w2, w3)
    assert out.shape == ref.shape == (batch, seq, d_model)
    assert jnp.allclose(out, ref, atol=1e-5, rtol=1e-5), "mismatch vs reference (test 1)"

    # --- Test 2: ragged token count (padded internally), PyTorch-layout wrapper ---
    batch2, seq2, d_model2, d_ff2 = 2, 7, 32, 64
    ka, kb, kc, kd = jax.random.split(knext, 4)
    std2 = 2.0 / (d_ff2 + d_model2)
    w1b = _trunc_normal(kb, (d_ff2, d_model2), std2)
    w2b = _trunc_normal(kc, (d_model2, d_ff2), std2)
    w3b = _trunc_normal(kd, (d_ff2, d_model2), std2)
    xb = jax.random.normal(ka, (batch2, seq2, d_model2), dtype=jnp.float32)
    outb = jax.block_until_ready(swiglu_ffn(xb, w1b, w2b, w3b))
    refb = _ref_swiglu(xb, w1b, w2b, w3b)
    assert outb.shape == refb.shape == (batch2, seq2, d_model2)
    assert jnp.allclose(outb, refb, atol=1e-5, rtol=1e-5), "mismatch vs reference (test 2)"

    print("KERNEL_OK")
</pallas_src>

<mosaic_0001>
module attributes {stable_mosaic.version = 11 : i64} {
  func.func @_swiglu_kernel(%arg0: i32, %arg1: i32, %arg2: memref<16x64xf32, #tpu.memory_space<vmem>>, %arg3: memref<64x128xf32, #tpu.memory_space<vmem>>, %arg4: memref<64x128xf32, #tpu.memory_space<vmem>>, %arg5: memref<128x64xf32, #tpu.memory_space<vmem>>, %arg6: memref<16x64xf32, #tpu.memory_space<vmem>>, %arg7: memref<16x64xf32, #tpu.memory_space<vmem>>) attributes {dimension_semantics = [#tpu.dimension_semantics<parallel>, #tpu.dimension_semantics<arbitrary>], iteration_bounds = array<i64: 1, 2>, scalar_prefetch = 0 : i64, scratch_operands = 1 : i64, tpu.core_type = #tpu.core_type<tc>, window_params = [{transform_indices = @transform_0, window_bounds = array<i64: 16, 64>}, {transform_indices = @transform_1, window_bounds = array<i64: 64, 128>}, {transform_indices = @transform_2, window_bounds = array<i64: 64, 128>}, {transform_indices = @transform_3, window_bounds = array<i64: 128, 64>}, {transform_indices = @transform_4, window_bounds = array<i64: 16, 64>}]} {
    %c0_i32 = arith.constant 0 : i32
    %0 = arith.cmpi eq, %arg1, %c0_i32 : i32
    %1 = arith.extui %0 : i1 to i32
    %c0_i32_0 = arith.constant 0 : i32
    %2 = arith.cmpi ne, %1, %c0_i32_0 : i32
    scf.if %2 {
      %cst_16 = arith.constant 0.000000e+00 : f32
      %23 = vector.broadcast %cst_16 : f32 to vector<16x64xf32>
      %c0_17 = arith.constant 0 : index
      %c0_18 = arith.constant 0 : index
      %24 = vector.load %arg7[%c0_17, %c0_18] : memref<16x64xf32, #tpu.memory_space<vmem>>, vector<16x64xf32>
      tpu.vector_store %arg7[%c0_17, %c0_18], %23 {strides = array<i32>} : memref<16x64xf32, #tpu.memory_space<vmem>>, vector<16x64xf32>,
    } else {
    }
    %c0 = arith.constant 0 : index
    %c0_1 = arith.constant 0 : index
    %3 = vector.load %arg2[%c0, %c0_1] : memref<16x64xf32, #tpu.memory_space<vmem>>, vector<16x64xf32>
    %c0_2 = arith.constant 0 : index
    %c0_3 = arith.constant 0 : index
    %4 = vector.load %arg3[%c0_2, %c0_3] : memref<64x128xf32, #tpu.memory_space<vmem>>, vector<64x128xf32>
    %cst = arith.constant dense<0.000000e+00> : vector<16x128xf32>
    %5 = tpu.matmul %3, %4, %cst {dimension_numbers = #tpu.dot_dimension_numbers<[1], [0], [0], [1], [0, 0, 1, 1], [], []>} : vector<16x64xf32>, vector<64x128xf32>, vector<16x128xf32> -> vector<16x128xf32>
    %c0_4 = arith.constant 0 : index
    %c0_5 = arith.constant 0 : index
    %6 = vector.load %arg4[%c0_4, %c0_5] : memref<64x128xf32, #tpu.memory_space<vmem>>, vector<64x128xf32>
    %cst_6 = arith.constant dense<0.000000e+00> : vector<16x128xf32>
    %7 = tpu.matmul %3, %6, %cst_6 {dimension_numbers = #tpu.dot_dimension_numbers<[1], [0], [0], [1], [0, 0, 1, 1], [], []>} : vector<16x64xf32>, vector<64x128xf32>, vector<16x128xf32> -> vector<16x128xf32>
    %8 = arith.negf %5 : vector<16x128xf32>
    %9 = math.exp %8 : vector<16x128xf32>
    %cst_7 = arith.constant 1.000000e+00 : f32
    %10 = vector.broadcast %cst_7 : f32 to vector<16x128xf32>
    %11 = arith.addf %10, %9 : vector<16x128xf32>
    %12 = arith.divf %10, %11 : vector<16x128xf32>
    %13 = arith.mulf %5, %12 : vector<16x128xf32>
    %14 = arith.mulf %13, %7 : vector<16x128xf32>
    %c0_8 = arith.constant 0 : index
    %c0_9 = arith.constant 0 : index
    %15 = vector.load %arg7[%c0_8, %c0_9] : memref<16x64xf32, #tpu.memory_space<vmem>>, vector<16x64xf32>
    %c0_10 = arith.constant 0 : index
    %c0_11 = arith.constant 0 : index
    %16 = vector.load %arg5[%c0_10, %c0_11] : memref<128x64xf32, #tpu.memory_space<vmem>>, vector<128x64xf32>
    %cst_12 = arith.constant dense<0.000000e+00> : vector<16x64xf32>
    %17 = tpu.matmul %14, %16, %cst_12 {dimension_numbers = #tpu.dot_dimension_numbers<[1], [0], [0], [1], [0, 0, 1, 1], [], []>} : vector<16x128xf32>, vector<128x64xf32>, vector<16x64xf32> -> vector<16x64xf32>
    %18 = arith.addf %15, %17 : vector<16x64xf32>
    %c0_13 = arith.constant 0 : index
    %c0_14 = arith.constant 0 : index
    %19 = vector.load %arg7[%c0_13, %c0_14] : memref<16x64xf32, #tpu.memory_space<vmem>>, vector<16x64xf32>
    tpu.vector_store %arg7[%c0_13, %c0_14], %18 {strides = array<i32>} : memref<16x64xf32, #tpu.memory_space<vmem>>, vector<16x64xf32>,
    %c1_i32 = arith.constant 1 : i32
    %20 = arith.cmpi eq, %arg1, %c1_i32 : i32
    %21 = arith.extui %20 : i1 to i32
    %c0_i32_15 = arith.constant 0 : i32
    %22 = arith.cmpi ne, %21, %c0_i32_15 : i32
    scf.if %22 {
      %c0_16 = arith.constant 0 : index
      %c0_17 = arith.constant 0 : index
      %23 = vector.load %arg7[%c0_16, %c0_17] : memref<16x64xf32, #tpu.memory_space<vmem>>, vector<16x64xf32>
      %c0_18 = arith.constant 0 : index
      %c0_19 = arith.constant 0 : index
      %24 = vector.load %arg6[%c0_18, %c0_19] : memref<16x64xf32, #tpu.memory_space<vmem>>, vector<16x64xf32>
      tpu.vector_store %arg6[%c0_18, %c0_19], %23 {strides = array<i32>} : memref<16x64xf32, #tpu.memory_space<vmem>>, vector<16x64xf32>,
    } else {
    }
    return
  }
  func.func @transform_0(%arg0: i32, %arg1: i32) -> (i32, i32) {
    %c0_i32 = arith.constant 0 : i32
    %c0_i32_0 = arith.constant 0 : i32
    return %arg0, %c0_i32 : i32, i32
  }
  func.func @transform_1(%arg0: i32, %arg1: i32) -> (i32, i32) {
    %c0_i32 = arith.constant 0 : i32
    %c0_i32_0 = arith.constant 0 : i32
    return %c0_i32, %arg1 : i32, i32
  }
  func.func @transform_2(%arg0: i32, %arg1: i32) -> (i32, i32) {
    %c0_i32 = arith.constant 0 : i32
    %c0_i32_0 = arith.constant 0 : i32
    return %c0_i32, %arg1 : i32, i32
  }
  func.func @transform_3(%arg0: i32, %arg1: i32) -> (i32, i32) {
    %c0_i32 = arith.constant 0 : i32
    %c0_i32_0 = arith.constant 0 : i32
    return %arg1, %c0_i32 : i32, i32
  }
  func.func @transform_4(%arg0: i32, %arg1: i32) -> (i32, i32) {
    %c0_i32 = arith.constant 0 : i32
    %c0_i32_0 = arith.constant 0 : i32
    return %arg0, %c0_i32 : i32, i32
  }
}

</mosaic_0001>

<bundles_post_ra>
// kernel: swiglu_ffn_pretransposed.1
= control target key start
LH: loop header
LB: loop body
LE: loop exit
PB: predicated region body
PF: predicated region fallthrough
CT: control target
= control target key end

     0   :  { %9 = vsyncpa [#allocation6], 0  ;;  %s1163_s15 = smov 0   ;;  %s1165_s16 = smov 0   ;;  %s1314_s0 = inlined_call_operand.vmem [shape: f32[16,64], index: 0, kind: input, shape index: {}]   ;;  %s1315_s1 = inlined_call_operand.vmem [shape: f32[64,256], index: 1, kind: input, shape index: {}]   ;;  %s1316_s2 = inlined_call_operand.vmem [shape: f32[64,256], index: 2, kind: input, shape index: {}]   ;;  %s1317_s3 = inlined_call_operand.vmem [shape: f32[256,64], index: 3, kind: input, shape index: {}]   ;;  %s1318_s4 = inlined_call_operand.hbm [shape: f32[16,64], index: 4, kind: output, shape index: {}]  }
   0x1   :  { %s1167_s17 = smov 0   ;;  %s1169_s18 = smov 0  }
   0x2   :  { %s1171_s19 = smov 0  }
   0x3 LB: > { %s806_s20 = sadd.s32 4294967295, %s1132_s19   ;;  %s24_s21 = sadd.s32 1, %s1128_s18  ;;  %s1132_s19 = sphi %s1171_s19, %s15_s19   ;;  %s1128_s18 = sphi %s1169_s18, %s1324_s18   ;;  %s1124_s17 = sphi %s1167_s17, %s1323_s17   ;;  %s1120_s16 = sphi %s1165_s16, %s1322_s16   ;;  %s1116_s15 = sphi %s1163_s15, %s1321_s15  }
   0x4   : > { %p25_p0 = scmp.ge.s32.totalorder %s24_s21, 2  ;;  %p67_p1 = scmp.ne.s32.totalorder %s1120_s16, %s1116_s15 }
   0x5   : > { %p68_p2 = scmp.eq.s32.totalorder %s1132_s19, 0  ;;  %s60_s24 = sadd.s32 1, %s1120_s16 }
   0x6   : > { %s1326_s21 = smov (%p25_p0, %s24_s21), 0  ;;  %p809_p5 = scmp.ge.s32.totalorder %s1132_s19, 2 }
   0x7   : > { %p1195_p3 = por %p68_p2, %p67_p1  ;;  %s57_s23 = ssub.s32 %s1128_s18, %s1326_s21 }
   0x8   : > { %p58_p4 = scmp.eq.s32.totalorder %s57_s23, 0  ;;  %180 = sbr.rel (%p809_p5) target bundleno = 31 (0x1f), region = 20 }
   0xa   : > { %s1203_s25 = scalar_select %p58_p4, %s1120_s16, %s60_s24  }
   0xf   : > { %183 = sbr.rel (!%p1195_p3) target bundleno = 23 (0x17), region = 24  ;;  %s185_s26 = sand.u32 (%p1195_p3), 1, %s1120_s16  }
  0x10   : > { %s811_s27 = sshll.u32 (%p1195_p3), %s1128_s18, 3  ;;  %s810_s28 = sshll.u32 (%p1195_p3), %s185_s26, 6 }
  0x11   : > { %s189_s5 = scalar_lea.vmem (%p1195_p3), %s1315_s1, %s811_s27  ;;  %s187_s6 = scalar_lea.vmem (%p1195_p3), [#allocation3], %s810_s28 }
  0x12   : > { %v231_v0 = vld [vmem:[%s189_s5] sm:$0xff] (%p1195_p3)  ;;  %v233_v1 = vld [vmem:[%s189_s5 + $0x10] sm:$0xff] (%p1195_p3) }
  0x13   : > { %v235_v2 = vld [vmem:[%s189_s5 + $0x20] sm:$0xff] (%p1195_p3)  ;;  %232 = vst [vmem:[%s187_s6] sm:$0xff] (%p1195_p3), %v231_v0  ;;  %234 = vst [vmem:[%s187_s6 + $0x8] sm:$0xff] (%p1195_p3), %v233_v1  ;;  %v237_v3 = vld [vmem:[%s189_s5 + $0x30] sm:$0xff] (%p1195_p3) }
  0x14   : > { %236 = vst [vmem:[%s187_s6 + $0x10] sm:$0xff] (%p1195_p3), %v235_v2  ;;  %v239_v4 = vld [vmem:[%s189_s5 + $0x40] sm:$0xff] (%p1195_p3)  ;;  %v241_v5 = vld [vmem:[%s189_s5 + $0x50] sm:$0xff] (%p1195_p3)  ;;  %238 = vst [vmem:[%s187_s6 + $0x18] sm:$0xff] (%p1195_p3), %v237_v3 }
  0x15   : > { %240 = vst [vmem:[%s187_s6 + $0x20] sm:$0xff] (%p1195_p3), %v239_v4  ;;  %242 = vst [vmem:[%s187_s6 + $0x28] sm:$0xff] (%p1195_p3), %v241_v5  ;;  %v243_v6 = vld [vmem:[%s189_s5 + $0x60] sm:$0xff] (%p1195_p3)  ;;  %v245_v7 = vld [vmem:[%s189_s5 + $0x70] sm:$0xff] (%p1195_p3) }
  0x16   : > { %244 = vst [vmem:[%s187_s6 + $0x30] sm:$0xff] %v243_v6  ;;  %246 = vst [vmem:[%s187_s6 + $0x38] sm:$0xff] %v245_v7 }
  0x17 PF: > { %252 = sbr.rel (!%p1195_p3) target bundleno = 31 (0x1f), region = 62  ;;  %s254_s7 = sand.u32 (%p1195_p3), 1, %s1120_s16  }
  0x18   : > { %s813_s8 = sshll.u32 (%p1195_p3), %s1128_s18, 3  ;;  %s812_s9 = sshll.u32 (%p1195_p3), %s254_s7, 6 }
  0x19   : > { %s258_s12 = scalar_lea.vmem (%p1195_p3), %s1316_s2, %s813_s8  ;;  %s256_s13 = scalar_lea.vmem (%p1195_p3), [#allocation4], %s812_s9 }
  0x1a   : > { %v300_v8 = vld [vmem:[%s258_s12] sm:$0xff] (%p1195_p3)  ;;  %v302_v9 = vld [vmem:[%s258_s12 + $0x10] sm:$0xff] (%p1195_p3) }
  0x1b   : > { %v304_v10 = vld [vmem:[%s258_s12 + $0x20] sm:$0xff] (%p1195_p3)  ;;  %301 = vst [vmem:[%s256_s13] sm:$0xff] (%p1195_p3), %v300_v8  ;;  %303 = vst [vmem:[%s256_s13 + $0x8] sm:$0xff] (%p1195_p3), %v302_v9  ;;  %v306_v11 = vld [vmem:[%s258_s12 + $0x30] sm:$0xff] (%p1195_p3) }
  0x1c   : > { %305 = vst [vmem:[%s256_s13 + $0x10] sm:$0xff] (%p1195_p3), %v304_v10  ;;  %v308_v12 = vld [vmem:[%s258_s12 + $0x40] sm:$0xff] (%p1195_p3)  ;;  %v310_v13 = vld [vmem:[%s258_s12 + $0x50] sm:$0xff] (%p1195_p3)  ;;  %307 = vst [vmem:[%s256_s13 + $0x18] sm:$0xff] (%p1195_p3), %v306_v11 }
  0x1d   : > { %309 = vst [vmem:[%s256_s13 + $0x20] sm:$0xff] (%p1195_p3), %v308_v12  ;;  %311 = vst [vmem:[%s256_s13 + $0x28] sm:$0xff] (%p1195_p3), %v310_v13  ;;  %v312_v14 = vld [vmem:[%s258_s12 + $0x60] sm:$0xff] (%p1195_p3)  ;;  %v314_v15 = vld [vmem:[%s258_s12 + $0x70] sm:$0xff] (%p1195_p3) }
  0x1e   : > { %313 = vst [vmem:[%s256_s13 + $0x30] sm:$0xff] %v312_v14  ;;  %315 = vst [vmem:[%s256_s13 + $0x38] sm:$0xff] %v314_v15 }
  0x1f PF: > { %p814_p6 = scmp.ge.s32.totalorder %s1132_s19, 1  ;;  %p329_p7 = scmp.lt.s32.totalorder %s1132_s19, 3 }
  0x21   : > { %p330_p8 = pnand %p814_p6, %p329_p7 }
  0x22   : > { %s336_s14 = sand.u32 (!%p330_p8), 1, %s1116_s15   ;;  %s817_s22 = sshll.u32 (!%p330_p8), %s1124_s17, 4 }
  0x23   : > { %333 = sbr.rel (%p330_p8) target bundleno = 562 (0x232), region = 104  ;;  %s815_s23 = sshll.u32 (!%p330_p8), %s336_s14, 6 }
  0x24   : > { %p384_p9 = scmp.lt.s32.totalorder (!%p330_p8), %s817_s22, 31  ;;  %s338_s29 = scalar_lea.vmem (!%p330_p8), [#allocation3], %s815_s23 }
  0x25   : > { %s1229_s30 = scalar_lea.vmem (!%p330_p8), [#allocation4], %s815_s23  ;;  %p819_p10 = scmp.ne.s32.totalorder (!%p330_p8), %s1124_s17, 0 }
  0x2a   : > { %s1328_s22 = smov (!%p384_p9, %s817_s22), 31  ;;  %393 = sbr.rel (%p819_p10) target bundleno = 49 (0x31), region = 116 }
  0x2b   : > { %s818_s24 = sshll.u32 %s1328_s22, 3  ;;  %vm394_vm0 = vcmask (!%p819_p10), 523264   ;;  %v1134_v16 = vmov (!%p819_p10), 0.0  }
  0x2c   : > { %s1227_s28 = scalar_lea.vmem %s1317_s3, %s818_s24  ;;  %395 = vst.msk [vmem:[#allocation2] sm:$0xff] (!%p819_p10), %vm394_vm0, %v1134_v16  ;;  %396 = vst.msk [vmem:[#allocation2 + $0x8] sm:$0xff] (!%p819_p10), %vm394_vm0, %v1134_v16 }
  0x31 PF: > { %v399_v17 = vld [vmem:[%s338_s29] sm:$0xff]  ;;  %v400_v18 = vld [vmem:[%s338_s29 + $0x8] sm:$0xff]  ;;  %v401_v19 = vld [vmem:[%s338_s29 + $0x10] sm:$0xff]  ;;  %vm407_vm1 = vcmask 523264   ;;  %p826_p11 = scmp.ne.s32.totalorder %s1124_s17, 1 }
  0x32   : > { %v942_v20 = vpack.c.bf16 %v400_v18, %v399_v17  ;;  %v402_v21 = vld [vmem:[%s338_s29 + $0x18] sm:$0xff]  ;;  %v403_v23 = vld [vmem:[%s338_s29 + $0x20] sm:$0xff]  ;;  %v404_v24 = vld [vmem:[%s338_s29 + $0x28] sm:$0xff] }
  0x33   : > { %v946_v22 = vpack.c.bf16 %v402_v21, %v401_v19  ;;  %v397_v25 = vld [vmem:[%s1314_s0] sm:$0xff]  ;;  %v950_v26 = vpack.c.bf16 %v404_v24, %v403_v23  ;;  %v406_v28 = vld [vmem:[%s338_s29 + $0x38] sm:$0xff]  ;;  %v489_v30 = vld [vmem:[%s1229_s30] sm:$0xff] }
  0x34   : > { %943 = vmatprep.subr.bf16.mxu1 %v942_v20  ;;  %885 = vmatprep.mubr.msk.f32.mxu1 %vm407_vm1, %v397_v25  ;;  %v405_v27 = vld [vmem:[%s338_s29 + $0x30] sm:$0xff]  ;;  %v490_v31 = vld [vmem:[%s1229_s30 + $0x8] sm:$0xff]  ;;  %v492_v34 = vld [vmem:[%s1229_s30 + $0x18] sm:$0xff] }
  0x35   : > { %945 = vmatpush3.bf16.msra.mxu1 %v942_v20  ;;  %v954_v29 = vpack.c.bf16 %v406_v28, %v405_v27  ;;  %v958_v32 = vpack.c.bf16 %v490_v31, %v489_v30  ;;  %v491_v33 = vld [vmem:[%s1229_s30 + $0x10] sm:$0xff]  ;;  %v398_v35 = vld [vmem:[%s1314_s0 + $0x8] sm:$0xff]  ;;  %v493_v37 = vld [vmem:[%s1229_s30 + $0x20] sm:$0xff] }
  0x36   : > { %947 = vmatprep.subr.bf16.mxu1 %v946_v22  ;;  %v962_v36 = vpack.c.bf16 %v492_v34, %v491_v33  ;;  %v494_v38 = vld [vmem:[%s1229_s30 + $0x28] sm:$0xff]  ;;  %v495_v40 = vld [vmem:[%s1229_s30 + $0x30] sm:$0xff]  ;;  %v496_v41 = vld [vmem:[%s1229_s30 + $0x38] sm:$0xff] }
  0x37   : > { %v966_v39 = vpack.c.bf16 %v494_v38, %v493_v37  ;;  %v970_v42 = vpack.c.bf16 %v496_v41, %v495_v40  ;;  %v590_v43 = vld [vmem:[%s1227_s28] sm:$0xff]  ;;  %v591_v44 = vld [vmem:[%s1227_s28 + $0x8] sm:$0xff]  ;;  %v592_v46 = vld [vmem:[%s1227_s28 + $0x10] sm:$0xff] }
  0x38   : > { %v974_v45 = vpack.c.bf16 %v591_v44, %v590_v43  ;;  %v593_v47 = vld [vmem:[%s1227_s28 + $0x18] sm:$0xff]  ;;  %v594_v49 = vld [vmem:[%s1227_s28 + $0x20] sm:$0xff]  ;;  %v595_v50 = vld [vmem:[%s1227_s28 + $0x28] sm:$0xff] }
  0x39   : > { %949 = vmatpush3.bf16.msra.mxu1 %v946_v22  ;;  %v978_v48 = vpack.c.bf16 %v593_v47, %v592_v46  ;;  %v982_v51 = vpack.c.bf16 %v595_v50, %v594_v49  ;;  %v596_v52 = vld [vmem:[%s1227_s28 + $0x30] sm:$0xff]  ;;  %v597_v53 = vld [vmem:[%s1227_s28 + $0x38] sm:$0xff]  ;;  %v598_v55 = vld [vmem:[%s1227_s28 + $0x40] sm:$0xff] }
  0x3a   : > { %951 = vmatprep.subr.bf16.mxu1 %v950_v26  ;;  %975 = vmatprep.subr.bf16.mxu0 %v974_v45  ;;  %v986_v54 = vpack.c.bf16 %v597_v53, %v596_v52  ;;  %v599_v56 = vld [vmem:[%s1227_s28 + $0x48] sm:$0xff]  ;;  %v600_v58 = vld [vmem:[%s1227_s28 + $0x50] sm:$0xff]  ;;  %v601_v59 = vld [vmem:[%s1227_s28 + $0x58] sm:$0xff] }
  0x3b   : > { %977 = vmatpush3.bf16.msra.mxu0 %v974_v45  ;;  %v990_v57 = vpack.c.bf16 %v599_v56, %v598_v55  ;;  %v994_v60 = vpack.c.bf16 %v601_v59, %v600_v58  ;;  %v602_v61 = vld [vmem:[%s1227_s28 + $0x60] sm:$0xff]  ;;  %v603_v62 = vld [vmem:[%s1227_s28 + $0x68] sm:$0xff]  ;;  %v604_v0 = vld [vmem:[%s1227_s28 + $0x70] sm:$0xff] }
  0x3c   : > { %979 = vmatprep.subr.bf16.mxu0 %v978_v48  ;;  %v998_v63 = vpack.c.bf16 %v603_v62, %v602_v61  ;;  %v605_v1 = vld [vmem:[%s1227_s28 + $0x78] sm:$0xff]  ;;  %v589_v19 = vld [vmem:[#allocation2 + $0x8] sm:$0xff]  ;;  %v588_v20 = vld [vmem:[#allocation2] sm:$0xff] }
  0x3d   : > { %953 = vmatpush3.bf16.msra.mxu1 %v950_v26  ;;  %v1002_v2 = vpack.c.bf16 %v605_v1, %v604_v0 }
  0x3e   : > { %955 = vmatprep.subr.bf16.mxu1 %v954_v29 }
  0x3f   : > { %981 = vmatpush3.bf16.msra.mxu0 %v978_v48 }
  0x40   : > { %983 = vmatprep.subr.bf16.mxu0 %v982_v51 }
  0x41   : > { %957 = vmatpush3.bf16.msra.mxu1 %v954_v29 }
  0x42   : > { %959 = vmatprep.subr.bf16.mxu1 %v958_v32 }
  0x43   : > { %985 = vmatpush3.bf16.msra.mxu0 %v982_v51 }
  0x44   : > { %886 = vmatmul.mubr.msk.f32.vlgmr.msra.gmra.mrb[0].mxu1 %vm407_vm1, %v398_v35  ;;  %987 = vmatprep.subr.bf16.mxu0 %v986_v54 }
  0x45   : > { %961 = vmatpush3.bf16.msra.mxu1 %v958_v32  ;;  %904 = vmatprep.mubr.msk.f32.mxu1 %vm407_vm1, %v397_v25 }
  0x46   : > { %963 = vmatprep.subr.bf16.mxu1 %v962_v36 }
  0x47   : > { %989 = vmatpush3.bf16.msra.mxu0 %v986_v54 }
  0x48   : > { %991 = vmatprep.subr.bf16.mxu0 %v990_v57 }
  0x49   : > { %965 = vmatpush3.bf16.msra.mxu1 %v962_v36 }
  0x4a   : > { %967 = vmatprep.subr.bf16.mxu1 %v966_v39 }
  0x4b   : > { %993 = vmatpush3.bf16.msra.mxu0 %v990_v57 }
  0x4c   : > { %995 = vmatprep.subr.bf16.mxu0 %v994_v60 }
  0x4d   : > { %969 = vmatpush3.bf16.msra.mxu1 %v966_v39 }
  0x4e   : > { %971 = vmatprep.subr.bf16.mxu1 %v970_v42 }
  0x4f   : > { %997 = vmatpush3.bf16.msra.mxu0 %v994_v60 }
  0x50   : > { %999 = vmatprep.subr.bf16.mxu0 %v998_v63 }
  0x51   : > { %973 = vmatpush3.bf16.msra.mxu1 %v970_v42 }
  0x53   : > { %1001 = vmatpush3.bf16.msra.mxu0 %v998_v63 }
  0x54   : > { %905 = vmatmul.mubr.msk.f32.vlgmr.msra.gmra.mrb[2].mxu1 %vm407_vm1, %v398_v35  ;;  %1003 = vmatprep.subr.bf16.mxu0 %v1002_v2 }
  0x57   : > { %1005 = vmatpush3.bf16.msra.mxu0 %v1002_v2 }
 0x117   : > { %v887_v3 = vpop.f32.mrb[0].mxu1 }
 0x118   : > { %v825_v4 = vmul.f32 -1.442695, %v887_v3  ;;  %v480_v5 = vpop.f32.mrb[1].mxu1 }
 0x119   : > { %v824_v6 = vmul.f32 -1.442695, %v480_v5 }
 0x11a   : > { %1056 = vpow2.f32 %v825_v4 }
 0x11b   : > { %1058 = vpow2.f32 %v824_v6 }
 0x124   : > { %v1057_v7 = vpop.eup %1056 }
 0x125   : > { %v1059_v8 = vpop.eup %1058  ;;  %v579_v9 = vadd.f32 1.0, %v1057_v7 }
 0x126   : > { %v578_v10 = vadd.f32 1.0, %v1059_v8 }
 0x127   : > { %1060 = vrcp.f32 %v579_v9  ;;  %v906_v11 = vpop.f32.mrb[2].mxu1 }
 0x128   : > { %1062 = vrcp.f32 %v578_v10  ;;  %v563_v12 = vpop.f32.mrb[3].mxu1 }
 0x131   : > { %v1061_v13 = vpop.eup %1060 }
 0x132   : > { %v1063_v14 = vpop.eup %1062  ;;  %v585_v15 = vmul.f32 %v1061_v13, %v887_v3 }
 0x133   : > { %v584_v16 = vmul.f32 %v1063_v14, %v480_v5 }
 0x134   : > { %v587_v17 = vmul.f32 %v906_v11, %v585_v15 }
 0x135   : > { %v586_v18 = vmul.f32 %v584_v16, %v563_v12 }
 0x137   : > { %939 = vmatprep.mubr.f32.mxu0 %v586_v18 }
 0x138   : > { %940 = vmatmul.mubr.f32.vlgmr.msra.gmra.mrb[0].mxu0 %v587_v17 }
 0x209   : > { %688 = sbr.rel (%p826_p11) target bundleno = 536 (0x218), region = 120 }
 0x20b   : > { %v941_v21 = vpop.f32.mrb[0].mxu0 }
 0x20c   : > { %v682_v22 = vadd.f32 %v941_v21, %v589_v19  ;;  %v672_v23 = vpop.f32.mrb[1].mxu0 }
 0x20d   : > { %v681_v24 = vadd.f32 %v672_v23, %v588_v20 }
 0x20e   : > { %684 = vst.msk [vmem:[#allocation2 + $0x8] sm:$0xff] %vm407_vm1, %v682_v22 }
 0x20f   : > { %683 = vst.msk [vmem:[#allocation2] sm:$0xff] %vm407_vm1, %v681_v24 }
 0x215   : > { %v690_v26 = vld [vmem:[#allocation2 + $0x8] sm:$0xff] }
 0x216   : > { %v689_v25 = vld [vmem:[#allocation2] sm:$0xff]  ;;  %692 = vst.msk [vmem:[#allocation5 + $0x8] sm:$0xff] %vm407_vm1, %v690_v26 }
 0x217   : > { %691 = vst.msk [vmem:[#allocation5] sm:$0xff] %vm407_vm1, %v689_v25 }
 0x218 PF: > { %p1273_p12 = scmp.eq.s32.totalorder %s806_s20, 1  ;;  %s1135_s9 = smov [#allocation5]  }
 0x219   : > { %s702_s10 = sshll.u32 %s1135_s9, 4  ;;  %s703_s10 = int_to_ptr.vmem [resolvable:$true] %s702_s10 }
 0x21a   : > { %s1064_s11 = scalar_lea.vmem %s703_s10, 256  ;;  %p1071_p2 = scmp.lt.s32.totalorder %s703_s10, %s703_s10 }
 0x21b   : > { %p1065_p13 = scmp.ne.s32.totalorder %s703_s10, %s1064_s11  ;;  %p1072_p3 = scmp.lt.s32.totalorder %s1064_s11, %s1064_s11 }
 0x21d   : > { %p1066_p0 = pnand %p1065_p13, %p1273_p12  ;;  %p1073_p4 = por %p1072_p3, %p1071_p2 }
 0x21f   : > { %p1067_p1 = pneg %p1066_p0 }
 0x221   : > { %p1074_p5 = pnand %p1073_p4, %p1067_p1 }
 0x223   : > { %1077 = shalt.err (!%p1074_p5)
}
 0x224   : > { %s1078_s20 = scalar_lea.hbm %s1318_s4, 256 }
 0x225   : > { %p1079_p6 = scmp.ne.s32.totalorder %s1318_s4, %s1078_s20  ;;  %p1084_p9 = scmp.lt.u32.totalorder %s1078_s20, %s1318_s4 }
 0x227   : > { %p1080_p7 = pnand %p1079_p6, %p1273_p12 }
 0x229   : > { %p1081_p8 = pneg %p1080_p7 }
 0x22b   : > { %p1086_p10 = pnand %p1084_p9, %p1081_p8 }
 0x22d   : > { %1089 = shalt.err (!%p1086_p10)
}
 0x22e   : > { %s1136_s24 = smov 128   ;;  %s1137_s26 = smov 8  }
 0x22f   : > { %1007 = dma.vmem_to_hbm [thread:$0]  (%p1273_p12), %s703_s10, 256, %s1318_s4, [#allocation6], %s1136_s24, %s1136_s24, %s1137_s26  }
 0x230   : > { %1111 = dma.done.wait (%p1273_p12), [#allocation6], 256  }
 0x231   : > { %1113 = vsyncadd (%p1273_p12), [#allocation6], 4294967040 }
 0x232 PF: > { %s15_s19 = sadd.s32 1, %s1132_s19   ;;  %s1321_s15 = smov %s1120_s16 }
 0x233   : > { %p12_p11 = scmp.ge.s32.totalorder %s15_s19, 4   ;;  %s1322_s16 = smov %s1203_s25 }
 0x234   : > { %s1323_s17 = smov %s1128_s18  ;;  %s1324_s18 = smov %s1326_s21 }
 0x235   :  { %14 = sbr.rel (!%p12_p11) target bundleno = 3 (0x3), region = 167 }
 0x23c   :  { %718 = vsyncpa [#allocation6], 1 }
 0x23d   :  { %720 = vsyncpa [#allocation6 + $0x1], 1 }

</bundles_post_ra>
